<compile_context>
chip_gen: v6e
topology: v6e:2x2x1
jax: 0.10.0
libtpu: 0.0.40
codegen_flags: <defaults>
</compile_context>

<pallas_src>
import jax
import jax.numpy as jnp
from jax.experimental import pallas as pl
from jax.experimental.pallas import tpu as pltpu


_LANE = 128                     # vreg lane width
_MAX_LANES = 1024               # cap for the lane-dense last dim
_PALLAS_MIN_ELEMS = 1 << 16     # below this, let XLA fuse jnp.maximum instead


def _relu_kernel(x_ref, o_ref):
    # Elementwise clamp(min=0) on the current VMEM tile (pure VPU op).
    x = x_ref[...]
    o_ref[...] = jnp.maximum(x, jnp.zeros((), x.dtype))


def _vmem_capacity_bytes() -> int:
    """Per-core VMEM capacity; conservative (v7x) fallback if query fails."""
    try:
        return int(pltpu.get_tpu_info().vmem_capacity_bytes)
    except Exception:
        return 64 * 1024 * 1024


def _block_budget(itemsize: int) -> tuple[int, int]:
    """(block_bytes, vmem_limit_bytes), generation-aware.

    Footprint = 4 x block (input + output, each double-buffered by the
    BlockSpec pipeline).  Keep ~25% VMEM headroom:
      v7x   (64 MiB/TC)  -> 12 MiB blocks, ~52 MiB limit
      v5e/v6e (128 MiB)  -> 24 MiB blocks, ~100 MiB limit
    """
    del itemsize  # budget is in bytes; dtype handled via tile_rows
    cap = _vmem_capacity_bytes()
    block = min((cap * 3 // 4) // 4, 24 * 1024 * 1024)
    limit = min(4 * block + (4 << 20), cap - (8 << 20))
    return block, limit


def _pick_lanes(aligned_total: int) -> int:
    """Largest power-of-two multiple of 128 (<= _MAX_LANES) dividing total."""
    m = aligned_total // _LANE
    f = _MAX_LANES // _LANE
    while f > 1 and m % f:
        f //= 2
    return _LANE * f


def _pick_tile_rows(rows: int, lanes: int, itemsize: int, block_bytes: int) -> int:
    """Row-tile size: big blocks, >=2 grid steps when possible, 8/16/32-aligned."""
    sub = max(8, 32 // itemsize)                 # sublane pack: 8 f32 / 16 bf16 / 32 i8
    target = max(1, block_bytes // (lanes * itemsize))
    target = min(target, (rows + 1) // 2)        # keep >= 2 grid steps (v7x dual-TC)
    tile = (target // sub) * sub                 # unmasked sublane tiling
    if tile == 0 or tile >= rows:
        return rows                              # too small to split cleanly: 1 block
    return tile


def _relu_2d(x2d: jax.Array, tile_rows: int, vmem_limit: int) -> jax.Array:
    rows, lanes = x2d.shape
    grid_r = (rows + tile_rows - 1) // tile_rows   # last block may be partial
    nbytes = rows * lanes * x2d.dtype.itemsize
    return pl.pallas_call(
        _relu_kernel,
        out_shape=jax.ShapeDtypeStruct((rows, lanes), x2d.dtype),
        grid=(grid_r,),
        in_specs=[pl.BlockSpec((tile_rows, lanes), lambda i: (i, 0))],
        out_specs=pl.BlockSpec((tile_rows, lanes), lambda i: (i, 0)),
        compiler_params=pltpu.CompilerParams(
            dimension_semantics=("parallel",),     # shard grid steps across TCs on v7x
            vmem_limit_bytes=int(vmem_limit),
        ),
        cost_estimate=pl.CostEstimate(
            flops=rows * lanes,
            transcendentals=0,
            bytes_accessed=2 * nbytes,
        ),
    )(x2d)


def net1_forward(x: jax.Array, *, force_pallas: bool = False) -> jax.Array:
    """Custom ReLU (input.clamp(min=0)). Shape/dtype preserved."""
    total = x.size
    if total == 0:
        return x

    zero = jnp.zeros((), x.dtype)
    if total < _PALLAS_MIN_ELEMS and not force_pallas:
        # Tiny tensors: a standalone pallas_call launch dwarfs the work;
        # let XLA fuse the max into neighboring ops instead.
        return jnp.maximum(x, zero)

    flat = x.reshape(-1)                       # contiguous reshape: free
    main = (total // _LANE) * _LANE            # 128-aligned prefix handled by Pallas
    if main == 0:
        return jnp.maximum(x, zero)

    itemsize = x.dtype.itemsize
    block_bytes, vmem_limit = _block_budget(itemsize)
    lanes = _pick_lanes(main)
    rows = main // lanes
    tile_rows = _pick_tile_rows(rows, lanes, itemsize, block_bytes)

    x2d = flat[:main].reshape(rows, lanes)     # no-op slice when main == total
    main_out = _relu_2d(x2d, tile_rows, vmem_limit).reshape(-1)

    if main == total:
        # Common (aligned) case: zero extra HBM traffic — no pad, no slice.
        return main_out.reshape(x.shape)

    # Misaligned tail (< 128 elements): compute it with plain jnp and join.
    # This costs at most one extra pass (the concatenate) vs. the ~2 extra
    # passes of the old full-array pad + slice.
    tail_out = jnp.maximum(flat[main:], zero)
    return jnp.concatenate([main_out, tail_out]).reshape(x.shape)


if __name__ == "__main__":
    key = jax.random.PRNGKey(0)

    # Net1 has no parameters; just an input tensor (NCHW, float32).
    x = jax.random.normal(key, (2, 4, 16, 16), dtype=jnp.float32)

    # Exercise the Pallas kernel (even though this size would normally take
    # the XLA-fusion fallback).  2048 elems -> zero-copy (2, 1024) view.
    y = net1_forward(x, force_pallas=True)
    jax.block_until_ready(y)
    y_ref = jnp.maximum(x, 0.0)
    assert y.shape == x.shape and y.dtype == x.dtype
    assert bool(jnp.allclose(y, y_ref)), "mismatch vs reference ReLU (pallas)"

    # Misaligned element count: Pallas on the 128-aligned prefix (15 x 128,
    # two grid steps with a partial edge block) + jnp tail.
    x2 = jax.random.normal(jax.random.PRNGKey(1), (2, 3, 17, 19), jnp.float32)
    y2 = net1_forward(x2, force_pallas=True)
    jax.block_until_ready(y2)
    assert bool(jnp.allclose(y2, jnp.maximum(x2, 0.0))), "mismatch (tail path)"

    # Larger aligned tensor: exercises the multi-step grid (lane-dense 1024
    # columns, >= 2 blocks so v7x can use both TensorCores).
    x3 = jax.random.normal(jax.random.PRNGKey(2), (4, 16, 64, 64), jnp.float32)
    y3 = net1_forward(x3, force_pallas=True)
    jax.block_until_ready(y3)
    assert bool(jnp.allclose(y3, jnp.maximum(x3, 0.0))), "mismatch (multi-block)"

    # Default path for tiny tensors (plain XLA fusion) must also match.
    y4 = net1_forward(x)
    jax.block_until_ready(y4)
    assert bool(jnp.allclose(y4, y_ref)), "mismatch vs reference ReLU (fallback)"

    print("KERNEL_OK")
</pallas_src>

<mosaic_0001>
module attributes {stable_mosaic.version = 11 : i64} {
  func.func @_relu_kernel(%arg0: i32, %arg1: memref<2x1024xf32, #tpu.memory_space<vmem>>, %arg2: memref<2x1024xf32, #tpu.memory_space<vmem>>) attributes {dimension_semantics = [#tpu.dimension_semantics<parallel>], iteration_bounds = array<i64: 1>, scalar_prefetch = 0 : i64, scratch_operands = 0 : i64, tpu.core_type = #tpu.core_type<tc>, window_params = [{transform_indices = @transform_0, window_bounds = array<i64: 2, 1024>}, {transform_indices = @transform_1, window_bounds = array<i64: 2, 1024>}]} {
    %c0 = arith.constant 0 : index
    %c0_0 = arith.constant 0 : index
    %0 = vector.load %arg1[%c0, %c0_0] : memref<2x1024xf32, #tpu.memory_space<vmem>>, vector<2x1024xf32>
    %cst = arith.constant 0.000000e+00 : f32
    %1 = vector.broadcast %cst : f32 to vector<2x1024xf32>
    %2 = arith.maximumf %0, %1 : vector<2x1024xf32>
    %c0_1 = arith.constant 0 : index
    %c0_2 = arith.constant 0 : index
    %3 = vector.load %arg2[%c0_1, %c0_2] : memref<2x1024xf32, #tpu.memory_space<vmem>>, vector<2x1024xf32>
    tpu.vector_store %arg2[%c0_1, %c0_2], %2 {strides = array<i32>} : memref<2x1024xf32, #tpu.memory_space<vmem>>, vector<2x1024xf32>,
    return
  }
  func.func @transform_0(%arg0: i32) -> (i32, i32) {
    %c0_i32 = arith.constant 0 : i32
    %c0_i32_0 = arith.constant 0 : i32
    return %arg0, %c0_i32 : i32, i32
  }
  func.func @transform_1(%arg0: i32) -> (i32, i32) {
    %c0_i32 = arith.constant 0 : i32
    %c0_i32_0 = arith.constant 0 : i32
    return %arg0, %c0_i32 : i32, i32
  }
}

</mosaic_0001>

<bundles_post_ra>
// kernel: tpu_custom_call.1
= control target key start
LH: loop header
LB: loop body
LE: loop exit
PB: predicated region body
PF: predicated region fallthrough
CT: control target
= control target key end

     0   :  { %6 = vsyncpa [#allocation3], 0  ;;  %s106_s0 = inlined_call_operand.hbm [shape: f32[2,1024], index: 0, kind: input, shape index: {}]   ;;  %s107_s1 = inlined_call_operand.hbm [shape: f32[2,1024], index: 1, kind: output, shape index: {}]  }
   0x1   :  { %7 = vsyncpa [#allocation4], 0  ;;  %s88_s6 = smov [#allocation2]  }
   0x2   :  { %s14_s7 = sshll.u32 %s88_s6, 4  ;;  %s15_s7 = int_to_ptr.vmem [resolvable:$true] %s14_s7 }
   0x3   :  { %s52_s8 = scalar_lea.vmem %s15_s7, 256  ;;  %p57_p1 = scmp.lt.s32.totalorder %s15_s7, %s15_s7 }
   0x4   :  { %p53_p0 = scmp.ne.s32.totalorder %s15_s7, %s52_s8  ;;  %p58_p2 = scmp.lt.s32.totalorder %s52_s8, %s52_s8 }
   0x6   :  { %p59_p3 = por %p58_p2, %p57_p1 }
   0x8   :  { %p60_p4 = pnand %p59_p3, %p53_p0 }
   0xa   :  { %63 = shalt.err (!%p60_p4)
}
   0xb   :  { %17 = dma.hbm_to_vmem [thread:$0]  %s106_s0, 256, %s15_s7, [#allocation3]  }
   0xc   :  { %84 = dma.done.wait [#allocation3], 256  }
   0xd   :  { %85 = vsyncadd [#allocation3], 4294967040  ;;  %s89_s11 = smov [#allocation5]   ;;  %v21_v0 = vld [vmem:[#allocation2] sm:$0xff]  ;;  %v22_v1 = vld [vmem:[#allocation2 + $0x8] sm:$0xff] }
   0xe   :  { %s33_s12 = sshll.u32 %s89_s11, 4  ;;  %v23_v2 = vmax.f32 %v21_v0, 0.0  ;;  %v24_v3 = vmax.f32 %v22_v1, 0.0  ;;  %s34_s12 = int_to_ptr.vmem [resolvable:$true] %s33_s12 }
   0xf   :  { %s64_s13 = scalar_lea.vmem %s34_s12, 256  ;;  %p69_p6 = scmp.lt.s32.totalorder %s34_s12, %s34_s12 }
  0x10   :  { %25 = vst [vmem:[#allocation5] sm:$0xff] %v23_v2  ;;  %26 = vst [vmem:[#allocation5 + $0x8] sm:$0xff] %v24_v3  ;;  %p65_p5 = scmp.ne.s32.totalorder %s34_s12, %s64_s13  ;;  %p70_p7 = scmp.lt.s32.totalorder %s64_s13, %s64_s13 }
  0x12   :  { %p71_p8 = por %p70_p7, %p69_p6 }
  0x14   :  { %p72_p9 = pnand %p71_p8, %p65_p5 }
  0x16   :  { %75 = shalt.err (!%p72_p9)
}
  0x17   :  { %36 = dma.vmem_to_hbm [thread:$0]  %s34_s12, 256, %s107_s1, [#allocation4]  }
  0x18   :  { %86 = dma.done.wait [#allocation4], 256  }
  0x19   :  { %87 = vsyncadd [#allocation4], 4294967040 }
  0x1a   :  { %40 = vsyncpa [#allocation3], 1 }
  0x1b   :  { %41 = vsyncpa [#allocation4], 1 }

</bundles_post_ra>
